<compile_context>
chip_gen: v7x
topology: tpu7x:2x2x1
jax: 0.10.0
libtpu: 0.0.40
codegen_flags: <defaults>
</compile_context>

<pallas_src>
import functools

import jax
import jax.numpy as jnp
from jax.experimental import pallas as pl
from jax.experimental.pallas import tpu as pltpu

INPUT_DIM = 17
HIDDEN_DIM = 128
EMBEDDING_DIM = 10
OUT_PAD = 128          # embedding dim padded to a full 128-lane vreg for unmasked stores
BN_EPS = 1e-5


def _siamese_kernel(x_ref, w1_ref, w2_ref, bn_ref, o_ref, *, b_real):
    """x_ref: (2*Bp, 17) f32 (branch1 rows then branch2 rows, zero-padded to Bp each)
       w1_ref: (17, 128) bf16      w2_ref: (128, 128) bf16 (cols >= 10 are zero)
       bn_ref: (4, 128) f32 rows = [gamma1, beta1, gamma2_pad, beta2_pad]
       o_ref : (2, Bp, 128) f32"""
    Bp = x_ref.shape[0] // 2
    inv_n = 1.0 / b_real

    bn = bn_ref[...]
    g1 = bn[0:1, :].reshape(1, 1, HIDDEN_DIM)
    be1 = bn[1:2, :].reshape(1, 1, HIDDEN_DIM)
    g2 = bn[2:3, :].reshape(1, 1, OUT_PAD)
    be2 = bn[3:4, :].reshape(1, 1, OUT_PAD)

    # fc1, both branches fused into one MXU matmul (bias omitted: cancelled by BN).
    x = x_ref[...].astype(jnp.bfloat16)
    h = jnp.dot(x, w1_ref[...], preferred_element_type=jnp.float32)      # (2Bp, 128) f32

    # bn1 + ReLU with per-branch batch statistics. Bp % 8 == 0 -> free retile.
    hb = h.reshape(2, Bp, HIDDEN_DIM)
    m1 = jnp.sum(hb, axis=1, keepdims=True) * inv_n                      # zero pad rows
    q1 = jnp.sum(hb * hb, axis=1, keepdims=True) * inv_n                 # contribute 0
    v1 = jnp.maximum(q1 - m1 * m1, 0.0)                                  # clamp variance
    inv1 = jax.lax.rsqrt(v1 + BN_EPS)                                    # EUP slot
    scale1 = g1 * inv1
    shift1 = be1 - m1 * scale1
    a = jnp.maximum(hb * scale1 + shift1, 0.0)                           # fused BN+ReLU
    if b_real < Bp:
        # Zero the padded rows so they don't contaminate bn2 batch statistics.
        row = jax.lax.broadcasted_iota(jnp.int32, (1, Bp, 1), 1)
        a = jnp.where(row < b_real, a, 0.0)

    # fc2, fused (2Bp,128)@(128,128); output columns padded to 128 -> lane-dense.
    z = jnp.dot(a.reshape(2 * Bp, HIDDEN_DIM).astype(jnp.bfloat16), w2_ref[...],
                preferred_element_type=jnp.float32)                      # (2Bp, 128)

    # bn2 with per-branch batch statistics (padded cols: gamma=0 -> output stays 0).
    zb = z.reshape(2, Bp, OUT_PAD)
    m2 = jnp.sum(zb, axis=1, keepdims=True) * inv_n
    q2 = jnp.sum(zb * zb, axis=1, keepdims=True) * inv_n
    v2 = jnp.maximum(q2 - m2 * m2, 0.0)
    inv2 = jax.lax.rsqrt(v2 + BN_EPS)
    scale2 = g2 * inv2
    shift2 = be2 - m2 * scale2
    o_ref[...] = (zb * scale2 + shift2).astype(o_ref.dtype)


def siamese_forward(x1, x2, kernel_params):
    """One grid-less pallas_call covering both siamese branches."""
    B = x1.shape[0]
    Bp = max(8, ((B + 7) // 8) * 8)        # sublane-align so in-kernel reshapes are free
    w1, w2p, bn = kernel_params

    if B == Bp:
        x = jnp.concatenate([x1, x2], axis=0)                     # (2B, 17), wrapper-side
    else:
        x = jnp.zeros((2 * Bp, INPUT_DIM), jnp.float32)
        x = x.at[:B, :].set(x1).at[Bp:Bp + B, :].set(x2)

    vmem = pl.BlockSpec(memory_space=pltpu.MemorySpace.VMEM)
    out = pl.pallas_call(
        functools.partial(_siamese_kernel, b_real=B),
        out_shape=jax.ShapeDtypeStruct((2, Bp, OUT_PAD), jnp.float32),
        in_specs=[vmem, vmem, vmem, vmem],
        out_specs=vmem,
    )(x, w1, w2p, bn)

    # Leading-axis branch split + lane/row un-pad: free XLA views/slices.
    return out[0, :B, :EMBEDDING_DIM], out[1, :B, :EMBEDDING_DIM]


def init_params(key):
    """Module-faithful parameters (PyTorch-style shapes/init).

    Linear weights stored as (in, out); BatchNorm gamma=1, beta=0 defaults."""
    k1, k2, k3, k4 = jax.random.split(key, 4)
    lim1 = 1.0 / jnp.sqrt(INPUT_DIM)
    lim2 = 1.0 / jnp.sqrt(HIDDEN_DIM)
    w1 = jax.random.uniform(k1, (INPUT_DIM, HIDDEN_DIM), jnp.float32, -lim1, lim1)
    b1 = jax.random.uniform(k2, (HIDDEN_DIM,), jnp.float32, -lim1, lim1)
    w2 = jax.random.uniform(k3, (HIDDEN_DIM, EMBEDDING_DIM), jnp.float32, -lim2, lim2)
    b2 = jax.random.uniform(k4, (EMBEDDING_DIM,), jnp.float32, -lim2, lim2)
    g1 = jnp.ones((HIDDEN_DIM,), jnp.float32)
    be1 = jnp.zeros((HIDDEN_DIM,), jnp.float32)
    g2 = jnp.ones((EMBEDDING_DIM,), jnp.float32)
    be2 = jnp.zeros((EMBEDDING_DIM,), jnp.float32)
    return (w1, b1, g1, be1, w2, b2, g2, be2)


def pack_params(params):
    """One-time repack into the kernel layout.

    * Linear biases dropped (exactly cancelled by training-mode BatchNorm).
    * Weights cast to bf16 (MXU-native); BN/affine math stays f32 in-kernel.
    * fc2 / bn2 params zero-padded to 128 lanes (lane-dense matmul + store).
    * The four BN vectors packed into one (4, 128) array -> one DMA instead of four.
    """
    w1, b1, g1, be1, w2, b2, g2, be2 = params
    del b1, b2
    w1_bf = w1.astype(jnp.bfloat16)
    w2p = (jnp.zeros((HIDDEN_DIM, OUT_PAD), jnp.float32)
           .at[:, :EMBEDDING_DIM].set(w2).astype(jnp.bfloat16))
    bn = jnp.zeros((4, OUT_PAD), jnp.float32)
    bn = bn.at[0, :HIDDEN_DIM].set(g1)
    bn = bn.at[1, :HIDDEN_DIM].set(be1)
    bn = bn.at[2, :EMBEDDING_DIM].set(g2)        # padded gamma stays 0 (keeps pad finite)
    bn = bn.at[3, :EMBEDDING_DIM].set(be2)
    return (w1_bf, w2p, bn)


def siamese_reference(x1, x2, params):
    """Pure-JAX reference matching the PyTorch module (training-mode BN)."""
    w1, b1, g1, be1, w2, b2, g2, be2 = params

    def branch(x):
        h = jnp.dot(x, w1, precision=jax.lax.Precision.HIGHEST) + b1
        m = jnp.mean(h, axis=0)
        v = jnp.mean((h - m) ** 2, axis=0)
        h = (h - m) * jax.lax.rsqrt(v + BN_EPS) * g1 + be1
        h = jnp.maximum(h, 0.0)
        z = jnp.dot(h, w2, precision=jax.lax.Precision.HIGHEST) + b2
        m2 = jnp.mean(z, axis=0)
        v2 = jnp.mean((z - m2) ** 2, axis=0)
        return (z - m2) * jax.lax.rsqrt(v2 + BN_EPS) * g2 + be2

    return branch(x1), branch(x2)


if __name__ == "__main__":
    key = jax.random.PRNGKey(0)
    kx1, kx2, kp = jax.random.split(key, 3)

    B = 8
    x1 = jax.random.normal(kx1, (B, INPUT_DIM), jnp.float32)
    x2 = jax.random.normal(kx2, (B, INPUT_DIM), jnp.float32)

    params = init_params(kp)
    kparams = pack_params(params)          # one-time weight repack (not per-call)

    out1, out2 = siamese_forward(x1, x2, kparams)
    jax.block_until_ready((out1, out2))

    assert out1.shape == (B, EMBEDDING_DIM) and out2.shape == (B, EMBEDDING_DIM)

    ref1, ref2 = siamese_reference(x1, x2, params)
    # bf16 MXU matmuls (deliberate, per perf review) -> slightly looser tolerance.
    assert jnp.allclose(out1, ref1, rtol=2e-2, atol=2e-2)
    assert jnp.allclose(out2, ref2, rtol=2e-2, atol=2e-2)

    print("KERNEL_OK")
</pallas_src>

<mosaic_0001>
module attributes {stable_mosaic.version = 11 : i64} {
  func.func @_siamese_kernel(%arg0: memref<16x17xf32, #tpu.memory_space<vmem>>, %arg1: memref<17x128xbf16, #tpu.memory_space<vmem>>, %arg2: memref<128x128xbf16, #tpu.memory_space<vmem>>, %arg3: memref<4x128xf32, #tpu.memory_space<vmem>>, %arg4: memref<2x8x128xf32, #tpu.memory_space<vmem>>) attributes {dimension_semantics = [], scalar_prefetch = 0 : i64, scratch_operands = 0 : i64, tpu.core_type = #tpu.core_type<tc>} {
    %c0 = arith.constant 0 : index
    %c0_0 = arith.constant 0 : index
    %0 = vector.load %arg3[%c0, %c0_0] : memref<4x128xf32, #tpu.memory_space<vmem>>, vector<4x128xf32>
    %1 = vector.extract_strided_slice %0 {offsets = [0, 0], sizes = [1, 128], strides = [1, 1]} : vector<4x128xf32> to vector<1x128xf32>
    %2 = vector.shape_cast %1 : vector<1x128xf32> to vector<1x1x128xf32>
    %3 = vector.extract_strided_slice %0 {offsets = [1, 0], sizes = [1, 128], strides = [1, 1]} : vector<4x128xf32> to vector<1x128xf32>
    %4 = vector.shape_cast %3 : vector<1x128xf32> to vector<1x1x128xf32>
    %5 = vector.extract_strided_slice %0 {offsets = [2, 0], sizes = [1, 128], strides = [1, 1]} : vector<4x128xf32> to vector<1x128xf32>
    %6 = vector.shape_cast %5 : vector<1x128xf32> to vector<1x1x128xf32>
    %7 = vector.extract_strided_slice %0 {offsets = [3, 0], sizes = [1, 128], strides = [1, 1]} : vector<4x128xf32> to vector<1x128xf32>
    %8 = vector.shape_cast %7 : vector<1x128xf32> to vector<1x1x128xf32>
    %c0_1 = arith.constant 0 : index
    %c0_2 = arith.constant 0 : index
    %9 = vector.load %arg0[%c0_1, %c0_2] : memref<16x17xf32, #tpu.memory_space<vmem>>, vector<16x17xf32>
    %10 = arith.truncf %9 : vector<16x17xf32> to vector<16x17xbf16>
    %c0_3 = arith.constant 0 : index
    %c0_4 = arith.constant 0 : index
    %11 = vector.load %arg1[%c0_3, %c0_4] : memref<17x128xbf16, #tpu.memory_space<vmem>>, vector<17x128xbf16>
    %cst = arith.constant dense<0.000000e+00> : vector<16x128xf32>
    %12 = tpu.matmul %10, %11, %cst {dimension_numbers = #tpu.dot_dimension_numbers<[1], [0], [0], [1], [0, 0, 1, 1], [], []>} : vector<16x17xbf16>, vector<17x128xbf16>, vector<16x128xf32> -> vector<16x128xf32>
    %13 = vector.shape_cast %12 : vector<16x128xf32> to vector<2x8x128xf32>
    %cst_5 = arith.constant dense<0.000000e+00> : vector<2x128xf32>
    %14 = vector.multi_reduction <add>, %13, %cst_5 [1] : vector<2x8x128xf32> to vector<2x128xf32>
    %15 = vector.shape_cast %14 : vector<2x128xf32> to vector<2x1x128xf32>
    %cst_6 = arith.constant 1.250000e-01 : f32
    %16 = vector.broadcast %cst_6 : f32 to vector<2x1x128xf32>
    %17 = arith.mulf %15, %16 : vector<2x1x128xf32>
    %18 = arith.mulf %13, %13 : vector<2x8x128xf32>
    %cst_7 = arith.constant dense<0.000000e+00> : vector<2x128xf32>
    %19 = vector.multi_reduction <add>, %18, %cst_7 [1] : vector<2x8x128xf32> to vector<2x128xf32>
    %20 = vector.shape_cast %19 : vector<2x128xf32> to vector<2x1x128xf32>
    %cst_8 = arith.constant 1.250000e-01 : f32
    %21 = vector.broadcast %cst_8 : f32 to vector<2x1x128xf32>
    %22 = arith.mulf %20, %21 : vector<2x1x128xf32>
    %23 = arith.mulf %17, %17 : vector<2x1x128xf32>
    %24 = arith.subf %22, %23 : vector<2x1x128xf32>
    %cst_9 = arith.constant 0.000000e+00 : f32
    %25 = vector.broadcast %cst_9 : f32 to vector<2x1x128xf32>
    %26 = arith.maximumf %24, %25 : vector<2x1x128xf32>
    %cst_10 = arith.constant 9.99999974E-6 : f32
    %27 = vector.broadcast %cst_10 : f32 to vector<2x1x128xf32>
    %28 = arith.addf %26, %27 : vector<2x1x128xf32>
    %29 = math.rsqrt %28 : vector<2x1x128xf32>
    %30 = vector.broadcast %2 : vector<1x1x128xf32> to vector<2x1x128xf32>
    %31 = arith.mulf %30, %29 : vector<2x1x128xf32>
    %32 = arith.mulf %17, %31 : vector<2x1x128xf32>
    %33 = vector.broadcast %4 : vector<1x1x128xf32> to vector<2x1x128xf32>
    %34 = arith.subf %33, %32 : vector<2x1x128xf32>
    %35 = vector.broadcast %31 : vector<2x1x128xf32> to vector<2x8x128xf32>
    %36 = arith.mulf %13, %35 : vector<2x8x128xf32>
    %37 = vector.broadcast %34 : vector<2x1x128xf32> to vector<2x8x128xf32>
    %38 = arith.addf %36, %37 : vector<2x8x128xf32>
    %cst_11 = arith.constant 0.000000e+00 : f32
    %39 = vector.broadcast %cst_11 : f32 to vector<2x8x128xf32>
    %40 = arith.maximumf %38, %39 : vector<2x8x128xf32>
    %41 = vector.shape_cast %40 : vector<2x8x128xf32> to vector<16x128xf32>
    %42 = arith.truncf %41 : vector<16x128xf32> to vector<16x128xbf16>
    %c0_12 = arith.constant 0 : index
    %c0_13 = arith.constant 0 : index
    %43 = vector.load %arg2[%c0_12, %c0_13] : memref<128x128xbf16, #tpu.memory_space<vmem>>, vector<128x128xbf16>
    %cst_14 = arith.constant dense<0.000000e+00> : vector<16x128xf32>
    %44 = tpu.matmul %42, %43, %cst_14 {dimension_numbers = #tpu.dot_dimension_numbers<[1], [0], [0], [1], [0, 0, 1, 1], [], []>} : vector<16x128xbf16>, vector<128x128xbf16>, vector<16x128xf32> -> vector<16x128xf32>
    %45 = vector.shape_cast %44 : vector<16x128xf32> to vector<2x8x128xf32>
    %cst_15 = arith.constant dense<0.000000e+00> : vector<2x128xf32>
    %46 = vector.multi_reduction <add>, %45, %cst_15 [1] : vector<2x8x128xf32> to vector<2x128xf32>
    %47 = vector.shape_cast %46 : vector<2x128xf32> to vector<2x1x128xf32>
    %cst_16 = arith.constant 1.250000e-01 : f32
    %48 = vector.broadcast %cst_16 : f32 to vector<2x1x128xf32>
    %49 = arith.mulf %47, %48 : vector<2x1x128xf32>
    %50 = arith.mulf %45, %45 : vector<2x8x128xf32>
    %cst_17 = arith.constant dense<0.000000e+00> : vector<2x128xf32>
    %51 = vector.multi_reduction <add>, %50, %cst_17 [1] : vector<2x8x128xf32> to vector<2x128xf32>
    %52 = vector.shape_cast %51 : vector<2x128xf32> to vector<2x1x128xf32>
    %cst_18 = arith.constant 1.250000e-01 : f32
    %53 = vector.broadcast %cst_18 : f32 to vector<2x1x128xf32>
    %54 = arith.mulf %52, %53 : vector<2x1x128xf32>
    %55 = arith.mulf %49, %49 : vector<2x1x128xf32>
    %56 = arith.subf %54, %55 : vector<2x1x128xf32>
    %cst_19 = arith.constant 0.000000e+00 : f32
    %57 = vector.broadcast %cst_19 : f32 to vector<2x1x128xf32>
    %58 = arith.maximumf %56, %57 : vector<2x1x128xf32>
    %cst_20 = arith.constant 9.99999974E-6 : f32
    %59 = vector.broadcast %cst_20 : f32 to vector<2x1x128xf32>
    %60 = arith.addf %58, %59 : vector<2x1x128xf32>
    %61 = math.rsqrt %60 : vector<2x1x128xf32>
    %62 = vector.broadcast %6 : vector<1x1x128xf32> to vector<2x1x128xf32>
    %63 = arith.mulf %62, %61 : vector<2x1x128xf32>
    %64 = arith.mulf %49, %63 : vector<2x1x128xf32>
    %65 = vector.broadcast %8 : vector<1x1x128xf32> to vector<2x1x128xf32>
    %66 = arith.subf %65, %64 : vector<2x1x128xf32>
    %67 = vector.broadcast %63 : vector<2x1x128xf32> to vector<2x8x128xf32>
    %68 = arith.mulf %45, %67 : vector<2x8x128xf32>
    %69 = vector.broadcast %66 : vector<2x1x128xf32> to vector<2x8x128xf32>
    %70 = arith.addf %68, %69 : vector<2x8x128xf32>
    %c0_21 = arith.constant 0 : index
    %c0_22 = arith.constant 0 : index
    %c0_23 = arith.constant 0 : index
    %71 = vector.load %arg4[%c0_21, %c0_22, %c0_23] : memref<2x8x128xf32, #tpu.memory_space<vmem>>, vector<2x8x128xf32>
    tpu.vector_store %arg4[%c0_21, %c0_22, %c0_23], %70 {strides = array<i32>} : memref<2x8x128xf32, #tpu.memory_space<vmem>>, vector<2x8x128xf32>,
    return
  }
}

</mosaic_0001>

<bundles_post_ra>
// kernel: tpu_custom_call.1
= control target key start
LH: loop header
LB: loop body
LE: loop exit
PB: predicated region body
PF: predicated region fallthrough
CT: control target
= control target key end

     0   :  { %9 = vsyncpa [#allocation3], 0  ;;  %s688_s0 = inlined_call_operand.hbm [shape: f32[16,17], index: 0, kind: input, shape index: {}]   ;;  %s689_s1 = inlined_call_operand.hbm [shape: bf16[17,128], index: 1, kind: input, shape index: {}]   ;;  %s690_s2 = inlined_call_operand.hbm [shape: bf16[128,128], index: 2, kind: input, shape index: {}]   ;;  %s691_s3 = inlined_call_operand.vmem [shape: f32[4,128], index: 3, kind: input, shape index: {}]   ;;  %s692_s4 = inlined_call_operand.hbm [shape: f32[2,8,128], index: 4, kind: output, shape index: {}]  }
   0x1   :  { %10 = vsyncpa [#allocation6], 0 }
   0x2   :  { %11 = vsyncpa [#allocation4], 0  ;;  %s573_s15 = smov [#allocation5]   ;;  %s479_s19 = scalar_lea.hbm %s689_s1, 192 }
   0x3   :  { %s29_s16 = sshll.u32 %s573_s15, 4  ;;  %p480_p0 = scmp.ne.s32.totalorder %s689_s1, %s479_s19  ;;  %s30_s16 = int_to_ptr.vmem [resolvable:$true] %s29_s16 }
   0x4   :  { %p483_p1 = scmp.lt.u32.totalorder %s479_s19, %s689_s1 }
   0x6   :  { %p485_p2 = pnand %p483_p1, %p480_p0 }
   0x8   :  { %488 = shalt.err (!%p485_p2)
}
   0x9   :  { %s489_s24 = scalar_lea.vmem %s30_s16, 192  ;;  %p494_p4 = scmp.lt.s32.totalorder %s30_s16, %s30_s16 }
   0xa   :  { %p490_p3 = scmp.ne.s32.totalorder %s30_s16, %s489_s24  ;;  %p495_p5 = scmp.lt.s32.totalorder %s489_s24, %s489_s24 }
   0xc   :  { %p496_p6 = por %p495_p5, %p494_p4 }
   0xe   :  { %p497_p7 = pnand %p496_p6, %p490_p3 }
  0x10   :  { %500 = shalt.err (!%p497_p7)
}
  0x11   :  { %s574_s25 = smov 64   ;;  %s575_s26 = smov 4  }
  0x12   :  { %35 = dma.hbm_to_vmem [thread:$0]  %s689_s1, 192, %s30_s16, [#allocation6], %s574_s25, %s574_s25, %s575_s26  }
  0x13   :  { %s576_s29 = smov [#allocation2]   ;;  %s501_s7 = scalar_lea.hbm %s688_s0, 256 }
  0x14   :  { %s17_s30 = sshll.u32 %s576_s29, 4  ;;  %p502_p8 = scmp.ne.s32.totalorder %s688_s0, %s501_s7  ;;  %s18_s30 = int_to_ptr.vmem [resolvable:$true] %s17_s30 }
  0x15   :  { %p505_p9 = scmp.lt.u32.totalorder %s501_s7, %s688_s0 }
  0x17   :  { %p507_p10 = pnand %p505_p9, %p502_p8 }
  0x19   :  { %510 = shalt.err (!%p507_p10)
}
  0x1a   :  { %s511_s12 = scalar_lea.vmem %s18_s30, 256  ;;  %p516_p12 = scmp.lt.s32.totalorder %s18_s30, %s18_s30 }
  0x1b   :  { %p512_p11 = scmp.ne.s32.totalorder %s18_s30, %s511_s12  ;;  %p517_p13 = scmp.lt.s32.totalorder %s511_s12, %s511_s12 }
  0x1d   :  { %p518_p0 = por %p517_p13, %p516_p12 }
  0x1f   :  { %p519_p1 = pnand %p518_p0, %p512_p11 }
  0x21   :  { %522 = shalt.err (!%p519_p1)
}
  0x22   :  { %s577_s1 = smov 128   ;;  %s578_s13 = smov 8  }
  0x23   :  { %23 = dma.hbm_to_vmem [thread:$0]  %s688_s0, 256, %s18_s30, [#allocation3], %s577_s1, %s577_s1, %s578_s13  }
  0x24   :  { %s579_s16 = smov [#allocation7]   ;;  %s523_s20 = scalar_lea.hbm %s690_s2, 1024 }
  0x25   :  { %s41_s17 = sshll.u32 %s579_s16, 4  ;;  %p524_p2 = scmp.ne.s32.totalorder %s690_s2, %s523_s20  ;;  %s42_s17 = int_to_ptr.vmem [resolvable:$true] %s41_s17 }
  0x26   :  { %p527_p3 = scmp.lt.u32.totalorder %s523_s20, %s690_s2 }
  0x28   :  { %p529_p4 = pnand %p527_p3, %p524_p2 }
  0x2a   :  { %532 = shalt.err (!%p529_p4)
}
  0x2b   :  { %s533_s27 = scalar_lea.vmem %s42_s17, 1024  ;;  %p538_p6 = scmp.lt.s32.totalorder %s42_s17, %s42_s17 }
  0x2c   :  { %p534_p5 = scmp.ne.s32.totalorder %s42_s17, %s533_s27  ;;  %p539_p7 = scmp.lt.s32.totalorder %s533_s27, %s533_s27 }
  0x2e   :  { %p540_p8 = por %p539_p7, %p538_p6 }
  0x30   :  { %p541_p9 = pnand %p540_p8, %p534_p5 }
  0x32   :  { %544 = shalt.err (!%p541_p9)
}
  0x33   :  { %47 = dma.hbm_to_vmem [thread:$0]  %s690_s2, 1024, %s42_s17, [#allocation6], %s574_s25, %s574_s25, %s575_s26  }
  0x34   :  { %567 = dma.done.wait [#allocation3], 256  }
  0x35   :  { %568 = vsyncadd [#allocation3], 4294967040 }
  0x36   :  { %569 = dma.done.wait [#allocation6], 1216  }
  0x37   :  { %570 = vsyncadd [#allocation6], 4294966080  ;;  %v580_v0 = vmov 0.0   ;;  %vm581_vm0 = vmmov 0   ;;  %vm80_vm1 = vcmask 1040384   ;;  %v461_v1 = vld [vmem:[#allocation5] sm:$0xff]   ;;  %v179_v59 = vlaneseq }
  0x38   :  { %422 = vmatprep.subr.bf16.mxu0 %v580_v0  ;;  %426 = vmatprep.mubr.msk.bf16.mxu0 %vm581_vm0, %v580_v0  ;;  %v582_v2 = vmov 0   ;;  %v462_v4 = vld [vmem:[#allocation5 + $0x8] ss:$0 sps:$4 sm:$0x11]   ;;  %v61_v5 = vld [vmem:[#allocation2] sm:$0xff]  ;;  %v62_v6 = vld [vmem:[#allocation2 + $0x8] sm:$0xff] }
  0x39   :  { %430 = vmatprep.subr.bf16.mxu1 %v580_v0  ;;  %446 = vmatprep.mubr.msk.bf16.mxu1 %vm581_vm0, %v580_v0  ;;  %v82_v3 = vsel %vm80_vm1, 65535, %v582_v2  ;;  %vm76_vm2 = vcmask 138240   ;;  %v63_v8 = vpack.c.bf16 %v62_v6, %v61_v5  ;;  %v463_v9 = vld [vmem:[#allocation7] sm:$0xff]   ;;  %v464_v10 = vld [vmem:[#allocation7 + $0x8] sm:$0xff]   ;;  %v465_v11 = vld [vmem:[#allocation7 + $0x10] sm:$0xff]   ;;  %v654_v60 = vshrl.u32 %v179_v59, 7 }
  0x3a   :  { %423 = vmatpush3.bf16.msra.mxu0 %v461_v1  ;;  %v84_v7 = vand.u32 %v462_v4, %v82_v3  ;;  %431 = vmatpush3.bf16.msra.mxu1 %v463_v9  ;;  %v466_v12 = vld [vmem:[#allocation7 + $0x18] sm:$0xff]   ;;  %v467_v13 = vld [vmem:[#allocation7 + $0x20] sm:$0xff]   ;;  %v468_v14 = vld [vmem:[#allocation7 + $0x28] sm:$0xff]  }
  0x3b   :  { %424 = vmatprep.subr.bf16.mxu0 %v580_v0  ;;  %432 = vmatprep.subr.bf16.mxu1 %v580_v0  ;;  %v469_v15 = vld [vmem:[#allocation7 + $0x30] sm:$0xff]   ;;  %v470_v16 = vld [vmem:[#allocation7 + $0x38] sm:$0xff]   ;;  %v659_v61 = vld [vmem:[%s691_s3] sm:$0xf]  ;;  %s583_s3 = smov [#allocation8]  }
  0x3c   :  { %s386_s26 = sshll.u32 %s583_s3, 4  ;;  %s387_s26 = int_to_ptr.vmem [resolvable:$true] %s386_s26 }
  0x3d   :  { %s545_s29 = scalar_lea.vmem %s387_s26, 256  ;;  %p550_p11 = scmp.lt.s32.totalorder %s387_s26, %s387_s26 }
  0x3e   :  { %425 = vmatpush3.bf16.msra.mxu0 %v84_v7  ;;  %433 = vmatpush3.bf16.msra.mxu1 %v464_v10  ;;  %v191_v7 = vsub.s32 1, %v654_v60  ;;  %p546_p10 = scmp.ne.s32.totalorder %s387_s26, %s545_s29  ;;  %p551_p12 = scmp.lt.s32.totalorder %s545_s29, %s545_s29 }
  0x3f   :  { %434 = vmatprep.subr.bf16.mxu1 %v580_v0 }
  0x40   :  { %p552_p13 = por %p551_p12, %p550_p11 }
  0x41   :  { %427 = vmatmul.mubr.msk.bf16.vlgmr.msra.gmra.mrb[0].mxu0 %vm76_vm2, %v63_v8 }
  0x42   :  { %435 = vmatpush3.bf16.msra.mxu1 %v465_v11  ;;  %p553_p0 = pnand %p552_p13, %p546_p10 }
  0x43   :  { %436 = vmatprep.subr.bf16.mxu1 %v580_v0 }
  0x46   :  { %437 = vmatpush3.bf16.msra.mxu1 %v466_v12 }
  0x47   :  { %438 = vmatprep.subr.bf16.mxu1 %v580_v0 }
  0x4a   :  { %439 = vmatpush3.bf16.msra.mxu1 %v467_v13 }
  0x4b   :  { %440 = vmatprep.subr.bf16.mxu1 %v580_v0 }
  0x4e   :  { %441 = vmatpush3.bf16.msra.mxu1 %v468_v14 }
  0x4f   :  { %442 = vmatprep.subr.bf16.mxu1 %v580_v0 }
  0x52   :  { %443 = vmatpush3.bf16.msra.mxu1 %v469_v15 }
  0x53   :  { %444 = vmatprep.subr.bf16.mxu1 %v580_v0  ;;  %v181_v0 = vsub.s32 0, %v654_v60 }
  0x56   :  { %445 = vmatpush3.bf16.msra.mxu1 %v470_v16 }
 0x114   :  { %v120_v17 = vpop.f32.mrb[0].mxu0 }
 0x115   :  { %v127_v18 = vrot.slane %v120_v17, 4  ;;  %v141_v19 = vmul.f32 %v120_v17, %v120_v17  ;;  %v428_v20 = vpop.f32.mrb[1].mxu0 }
 0x116   :  { %v123_v21 = vpop.f32.mrb[2].mxu0 }
 0x117   :  { %v128_v22 = vadd.f32 %v127_v18, %v120_v17  ;;  %v143_v23 = vrot.slane %v141_v19, 4  ;;  %v133_v24 = vrot.slane %v123_v21, 4  ;;  %v142_v25 = vmul.f32 %v123_v21, %v123_v21  ;;  %v429_v26 = vpop.f32.mrb[3].mxu0 }
 0x119   :  { %v129_v27 = vrot.slane %v128_v22, 2  ;;  %v144_v28 = vadd.f32 %v143_v23, %v141_v19  ;;  %v134_v29 = vadd.f32 %v133_v24, %v123_v21  ;;  %v149_v30 = vrot.slane %v142_v25, 4 }
 0x11b   :  { %v130_v31 = vadd.f32 %v129_v27, %v128_v22  ;;  %v145_v32 = vrot.slane %v144_v28, 2  ;;  %v135_v33 = vrot.slane %v134_v29, 2  ;;  %v150_v34 = vadd.f32 %v149_v30, %v142_v25 }
 0x11d   :  { %v131_v35 = vrot.slane %v130_v31, 1  ;;  %v146_v36 = vadd.f32 %v145_v32, %v144_v28  ;;  %v136_v37 = vadd.f32 %v135_v33, %v134_v29  ;;  %v151_v38 = vrot.slane %v150_v34, 2 }
 0x11f   :  { %v132_v39 = vadd.f32 %v131_v35, %v130_v31  ;;  %v147_v40 = vrot.slane %v146_v36, 1  ;;  %v137_v41 = vrot.slane %v136_v37, 1  ;;  %v152_v42 = vadd.f32 %v151_v38, %v150_v34 }
 0x121   :  { %v139_v43 = vmul.f32 0.125, %v132_v39  ;;  %v148_v44 = vadd.f32 %v147_v40, %v146_v36  ;;  %v138_v45 = vadd.f32 %v137_v41, %v136_v37  ;;  %v153_v46 = vrot.slane %v152_v42, 1 }
 0x123   :  { %v155_v47 = vmul.f32 0.125, %v148_v44  ;;  %v157_v48 = vmul.f32 %v139_v43, %v139_v43  ;;  %v140_v49 = vmul.f32 0.125, %v138_v45  ;;  %v154_v50 = vadd.f32 %v153_v46, %v152_v42 }
 0x125   :  { %v159_v51 = vsub.f32 %v155_v47, %v157_v48  ;;  %v156_v52 = vmul.f32 0.125, %v154_v50  ;;  %v158_v53 = vmul.f32 %v140_v49, %v140_v49 }
 0x127   :  { %v161_v54 = vmax.f32 %v159_v51, 0.0  ;;  %v160_v55 = vsub.f32 %v156_v52, %v158_v53 }
 0x129   :  { %v163_v56 = vadd.f32 1e-05, %v161_v54  ;;  %v162_v57 = vmax.f32 %v160_v55, 0.0 }
 0x12b   :  { %471 = vrsqrt.f32 %v163_v56  ;;  %v164_v58 = vadd.f32 1e-05, %v162_v57 }
 0x12d   :  { %473 = vrsqrt.f32 %v164_v58 }
 0x135   :  { %v472_v62 = vpop.eup %471 }
 0x136   :  { %v167_v63 = vmul.f32 %v472_v62, %v659_v61 }
 0x137   :  { %v474_v1 = vpop.eup %473 }
 0x138   :  { %v169_v2 = vmul.f32 %v167_v63, %v139_v43  ;;  %v168_v3 = vmul.f32 %v474_v1, %v659_v61  ;;  %v182_v5 = vrot.slane %v167_v63, %v181_v0 }
 0x13a   :  { %v173_v4 = vrot.slane %v169_v2, 7  ;;  %v170_v6 = vmul.f32 %v168_v3, %v140_v49  ;;  %v186_v9 = vrot.slane %v168_v3, %v181_v0  ;;  %v187_v11 = vmul.f32 %v182_v5, %v120_v17 }
 0x13b   :  { %v361_v3 = vsub.s32 2, %v654_v60 }
 0x13c   :  { %v174_v8 = vrot.slane %v170_v6, 7  ;;  %v177_v10 = vsub.f32 %v659_v61, %v173_v4  ;;  %v188_v14 = vmul.f32 %v186_v9, %v123_v21 }
 0x13e   :  { %v178_v12 = vsub.f32 %v659_v61, %v174_v8  ;;  %v192_v13 = vrot.slane %v177_v10, %v191_v7  ;;  %v371_v10 = vsub.s32 3, %v654_v60 }
 0x140   :  { %v196_v15 = vrot.slane %v178_v12, %v191_v7  ;;  %v197_v16 = vadd.f32 %v192_v13, %v187_v11 }
 0x142   :  { %v198_v18 = vadd.f32 %v196_v15, %v188_v14  ;;  %v199_v19 = vmax.f32 %v197_v16, 0.0 }
 0x144   :  { %v200_v20 = vmax.f32 %v198_v18, 0.0 }
 0x146   :  { %v201_v22 = vpack.c.bf16 %v200_v20, %v199_v19 }
 0x148   :  { %447 = vmatmul.mubr.bf16.vlgmr.msra.gmra.mrb[0].mxu1 %v201_v22 }
 0x21b   :  { %v300_v23 = vpop.f32.mrb[0].mxu1 }
 0x21c   :  { %v307_v24 = vrot.slane %v300_v23, 4  ;;  %v321_v25 = vmul.f32 %v300_v23, %v300_v23  ;;  %v448_v26 = vpop.f32.mrb[1].mxu1 }
 0x21d   :  { %v303_v27 = vpop.f32.mrb[2].mxu1 }
 0x21e   :  { %v308_v28 = vadd.f32 %v307_v24, %v300_v23  ;;  %v323_v29 = vrot.slane %v321_v25, 4  ;;  %v313_v30 = vrot.slane %v303_v27, 4  ;;  %v322_v17 = vmul.f32 %v303_v27, %v303_v27  ;;  %v449_v31 = vpop.f32.mrb[3].mxu1 }
 0x220   :  { %v309_v32 = vrot.slane %v308_v28, 2  ;;  %v324_v33 = vadd.f32 %v323_v29, %v321_v25  ;;  %v314_v21 = vadd.f32 %v313_v30, %v303_v27  ;;  %v329_v34 = vrot.slane %v322_v17, 4 }
 0x222   :  { %v310_v35 = vadd.f32 %v309_v32, %v308_v28  ;;  %v325_v36 = vrot.slane %v324_v33, 2  ;;  %v315_v37 = vrot.slane %v314_v21, 2  ;;  %v330_v38 = vadd.f32 %v329_v34, %v322_v17 }
 0x224   :  { %v311_v39 = vrot.slane %v310_v35, 1  ;;  %v326_v40 = vadd.f32 %v325_v36, %v324_v33  ;;  %v316_v41 = vadd.f32 %v315_v37, %v314_v21  ;;  %v331_v42 = vrot.slane %v330_v38, 2 }
 0x226   :  { %v312_v43 = vadd.f32 %v311_v39, %v310_v35  ;;  %v327_v44 = vrot.slane %v326_v40, 1  ;;  %v317_v45 = vrot.slane %v316_v41, 1  ;;  %v332_v46 = vadd.f32 %v331_v42, %v330_v38 }
 0x228   :  { %v319_v47 = vmul.f32 0.125, %v312_v43  ;;  %v328_v48 = vadd.f32 %v327_v44, %v326_v40  ;;  %v318_v49 = vadd.f32 %v317_v45, %v316_v41  ;;  %v333_v50 = vrot.slane %v332_v46, 1 }
 0x22a   :  { %v335_v51 = vmul.f32 0.125, %v328_v48  ;;  %v337_v52 = vmul.f32 %v319_v47, %v319_v47  ;;  %v320_v53 = vmul.f32 0.125, %v318_v49  ;;  %v334_v54 = vadd.f32 %v333_v50, %v332_v46 }
 0x22c   :  { %v339_v55 = vsub.f32 %v335_v51, %v337_v52  ;;  %v336_v56 = vmul.f32 0.125, %v334_v54  ;;  %v338_v57 = vmul.f32 %v320_v53, %v320_v53 }
 0x22e   :  { %v341_v58 = vmax.f32 %v339_v55, 0.0  ;;  %v340_v59 = vsub.f32 %v336_v56, %v338_v57 }
 0x230   :  { %v343_v62 = vadd.f32 1e-05, %v341_v58  ;;  %v342_v63 = vmax.f32 %v340_v59, 0.0 }
 0x232   :  { %475 = vrsqrt.f32 %v343_v62  ;;  %v344_v0 = vadd.f32 1e-05, %v342_v63 }
 0x234   :  { %477 = vrsqrt.f32 %v344_v0 }
 0x23c   :  { %v476_v1 = vpop.eup %475 }
 0x23d   :  { %v347_v2 = vmul.f32 %v476_v1, %v659_v61 }
 0x23e   :  { %v478_v4 = vpop.eup %477 }
 0x23f   :  { %v349_v5 = vmul.f32 %v347_v2, %v319_v47  ;;  %v348_v6 = vmul.f32 %v478_v4, %v659_v61  ;;  %v362_v7 = vrot.slane %v347_v2, %v361_v3 }
 0x241   :  { %v350_v8 = vmul.f32 %v348_v6, %v320_v53  ;;  %v353_v9 = vrot.slane %v349_v5, 7  ;;  %v366_v11 = vrot.slane %v348_v6, %v361_v3  ;;  %v367_v14 = vmul.f32 %v362_v7, %v300_v23 }
 0x243   :  { %v354_v12 = vrot.slane %v350_v8, 7  ;;  %v357_v13 = vsub.f32 %v659_v61, %v353_v9  ;;  %v368_v18 = vmul.f32 %v366_v11, %v303_v27 }
 0x245   :  { %v358_v15 = vsub.f32 %v659_v61, %v354_v12  ;;  %v372_v16 = vrot.slane %v357_v13, %v371_v10 }
 0x247   :  { %v376_v19 = vrot.slane %v358_v15, %v371_v10  ;;  %v377_v20 = vadd.f32 %v372_v16, %v367_v14 }
 0x249   :  { %v378_v22 = vadd.f32 %v376_v19, %v368_v18  ;;  %379 = vst [vmem:[#allocation8] sm:$0xff] %v377_v20 }
 0x24b   :  { %380 = vst [vmem:[#allocation8 + $0x8] sm:$0xff] %v378_v22 }
 0x24c   :  { %556 = shalt.err (!%p553_p0)
}
 0x24d   :  { %s557_s6 = scalar_lea.hbm %s692_s4, 256 }
 0x24e   :  { %p558_p1 = scmp.ne.s32.totalorder %s692_s4, %s557_s6  ;;  %p561_p2 = scmp.lt.u32.totalorder %s557_s6, %s692_s4 }
 0x250   :  { %p563_p3 = pnand %p561_p2, %p558_p1 }
 0x252   :  { %566 = shalt.err (!%p563_p3)
}
 0x253   :  { %392 = dma.vmem_to_hbm [thread:$0]  %s387_s26, 256, %s692_s4, [#allocation4], %s577_s1, %s577_s1, %s578_s13  }
 0x254   :  { %571 = dma.done.wait [#allocation4], 256  }
 0x255   :  { %572 = vsyncadd [#allocation4], 4294967040 }
 0x256   :  { %396 = vsyncpa [#allocation3], 1 }
 0x257   :  { %397 = vsyncpa [#allocation6], 1 }
 0x258   :  { %398 = vsyncpa [#allocation4], 1 }

</bundles_post_ra>
